<compile_context>
chip_gen: v6e
topology: v6e:2x2x1
jax: 0.10.0
libtpu: 0.0.40
codegen_flags: <defaults>
</compile_context>

<pallas_src>
import functools

import jax
import jax.numpy as jnp
from jax.experimental import pallas as pl
from jax.experimental.pallas import tpu as pltpu


_LANE = 128          # lane width (last dim alignment)
_SUBLANE = 16        # bf16-safe sublane multiple for row tiles
_MAX_SINGLE_K = 2048 # largest K handled without a reduction grid axis
_REDUCE_TK = 512     # K tile for the reduction fallback


def _round_up(v, m):
    return (v + m - 1) // m * m


# ----------------------------------------------------------------------------
# Kernels
# ----------------------------------------------------------------------------
def _lr_kernel_fused(x_ref, w_ref, b_ref, o_ref):
    """Single K block: matmul + bias + sigmoid, no accumulator scratch."""
    a = x_ref[...].astype(jnp.bfloat16)               # VPU cast, overlaps DMA
    logits = jnp.dot(a, w_ref[...], preferred_element_type=jnp.float32)
    logits = logits + b_ref[...]                       # [tm,tn] + [1,tn]
    o_ref[...] = jax.nn.sigmoid(logits).astype(o_ref.dtype)


def _lr_kernel_reduce(x_ref, w_ref, b_ref, o_ref, acc_ref):
    """K-reduction path for large input_dim."""
    k = pl.program_id(2)

    @pl.when(k == 0)
    def _():
        acc_ref[...] = jnp.zeros_like(acc_ref)

    acc_ref[...] += jnp.dot(x_ref[...].astype(jnp.bfloat16), w_ref[...],
                            preferred_element_type=jnp.float32)

    @pl.when(k == pl.num_programs(2) - 1)
    def _():
        o_ref[...] = jax.nn.sigmoid(acc_ref[...] + b_ref[...]).astype(o_ref.dtype)


# ----------------------------------------------------------------------------
# One-time parameter preparation (hoisted out of the forward pass)
# ----------------------------------------------------------------------------
def prepare_lr_params(weight, bias):
    """Transpose + pad + bf16-cast weight once; pad bias.

    weight: [out_dim, in_dim] (PyTorch nn.Linear layout); bias: [out_dim].
    Returns (w_t [Kp, Np] bf16, bias_p [1, Np] f32).
    """
    N, K = weight.shape
    Np = _round_up(N, _LANE)
    Kp = _round_up(K, _REDUCE_TK) if K > _MAX_SINGLE_K else K
    w_t = jnp.pad(weight.T.astype(jnp.bfloat16), ((0, Kp - K), (0, Np - N)))
    b_p = jnp.pad(bias.astype(jnp.float32).reshape(1, -1), ((0, 0), (0, Np - N)))
    return w_t, b_p


def _vmem_budget(tm, tn, tk):
    """Double-buffered footprint estimate with margin, capped for v7x (64 MiB)."""
    est = 2 * (tm * tk * 4       # x tile (f32 in HBM)
               + tk * tn * 2     # W^T tile (bf16)
               + tm * tn * 4     # output tile (f32)
               + tn * 4)         # bias tile
    est += tm * tn * 4           # f32 accumulator (reduction path)
    return min(48 * 1024 * 1024, max(2 * est, 32 * 1024 * 1024))


# ----------------------------------------------------------------------------
# Forward pass
# ----------------------------------------------------------------------------
@functools.partial(jax.jit, static_argnames=("out_dim",))
def lr_forward(x, w_t, b_p, *, out_dim):
    """sigmoid(x @ W.T + b) using pre-prepared (padded, bf16) W^T and bias."""
    M, K = x.shape
    Kp, Np = w_t.shape

    # --- tile heuristics ---------------------------------------------------
    tn = 256 if Np % 256 == 0 else 128
    tm = min(512, _round_up(M, _SUBLANE))
    # Give the v7x megacore >=2 parallel row blocks when the batch allows it.
    if M > _SUBLANE and pl.cdiv(M, tm) < 2:
        tm = max(_SUBLANE, _round_up(pl.cdiv(M, 2), _SUBLANE))
    grid_m = pl.cdiv(M, tm)
    grid_n = Np // tn

    if Kp <= _MAX_SINGLE_K:
        # Typical LR regime: no K grid axis, no accumulator, weight resident.
        assert Kp == K
        out = pl.pallas_call(
            _lr_kernel_fused,
            out_shape=jax.ShapeDtypeStruct((M, Np), jnp.float32),
            grid_spec=pltpu.PrefetchScalarGridSpec(
                num_scalar_prefetch=0,
                grid=(grid_m, grid_n),
                in_specs=[
                    pl.BlockSpec((tm, K), lambda i, j: (i, 0)),   # x row tile
                    pl.BlockSpec((K, tn), lambda i, j: (0, j)),   # resident W^T
                    pl.BlockSpec((1, tn), lambda i, j: (0, j)),   # bias
                ],
                out_specs=pl.BlockSpec((tm, tn), lambda i, j: (i, j)),
            ),
            compiler_params=pltpu.CompilerParams(
                dimension_semantics=("parallel", "parallel"),
                vmem_limit_bytes=_vmem_budget(tm, tn, K),
            ),
        )(x, w_t, b_p)
    else:
        # Large input_dim: K-reduction with a persistent f32 accumulator.
        tk = _REDUCE_TK
        x_p = jnp.pad(x, ((0, 0), (0, Kp - K)))      # zero-pad K (exact reduce)
        out = pl.pallas_call(
            _lr_kernel_reduce,
            out_shape=jax.ShapeDtypeStruct((M, Np), jnp.float32),
            grid_spec=pltpu.PrefetchScalarGridSpec(
                num_scalar_prefetch=0,
                grid=(grid_m, grid_n, Kp // tk),
                in_specs=[
                    pl.BlockSpec((tm, tk), lambda i, j, k: (i, k)),
                    pl.BlockSpec((tk, tn), lambda i, j, k: (k, j)),
                    pl.BlockSpec((1, tn), lambda i, j, k: (0, j)),
                ],
                out_specs=pl.BlockSpec((tm, tn), lambda i, j, k: (i, j)),
                scratch_shapes=[pltpu.VMEM((tm, tn), jnp.float32)],
            ),
            compiler_params=pltpu.CompilerParams(
                dimension_semantics=("parallel", "parallel", "arbitrary"),
                vmem_limit_bytes=_vmem_budget(tm, tn, tk),
            ),
        )(x_p, w_t, b_p)

    return out[:, :out_dim]


# ----------------------------------------------------------------------------
if __name__ == "__main__":
    key = jax.random.PRNGKey(0)
    k_x, k_w, k_b = jax.random.split(key, 3)

    # Small deterministic problem consistent with LR(input_dim, output_dim).
    batch, input_dim, output_dim = 64, 32, 16

    x = jax.random.normal(k_x, (batch, input_dim), jnp.float32)
    lim = 1.0 / float(input_dim) ** 0.5
    weight = jax.random.uniform(k_w, (output_dim, input_dim), jnp.float32, -lim, lim)
    bias = jax.random.uniform(k_b, (output_dim,), jnp.float32, -lim, lim)

    # One-time parameter prep (transpose / pad / bf16 cast), then forward.
    w_t, b_p = prepare_lr_params(weight, bias)
    out = lr_forward(x, w_t, b_p, out_dim=output_dim)
    jax.block_until_ready(out)

    # Reference check against plain-JAX f32 forward (bf16 MXU -> looser tol).
    ref = jax.nn.sigmoid(x @ weight.T + bias)

    assert out.shape == (batch, output_dim)
    assert bool(jnp.all(jnp.isfinite(out)))
    assert bool(jnp.all((out >= 0.0) & (out <= 1.0)))
    assert bool(jnp.allclose(out, ref, atol=2e-2, rtol=2e-2))

    print("KERNEL_OK")
</pallas_src>

<mosaic_0001>
module attributes {stable_mosaic.version = 11 : i64} {
  func.func @_lr_kernel_fused(%arg0: i32, %arg1: i32, %arg2: memref<32x32xf32, #tpu.memory_space<vmem>>, %arg3: memref<32x128xbf16, #tpu.memory_space<vmem>>, %arg4: memref<1x128xf32, #tpu.memory_space<vmem>>, %arg5: memref<32x128xf32, #tpu.memory_space<vmem>>) attributes {dimension_semantics = [#tpu.dimension_semantics<parallel>, #tpu.dimension_semantics<parallel>], iteration_bounds = array<i64: 2, 1>, scalar_prefetch = 0 : i64, scratch_operands = 0 : i64, tpu.core_type = #tpu.core_type<tc>, window_params = [{transform_indices = @transform_0, window_bounds = array<i64: 32, 32>}, {transform_indices = @transform_1, window_bounds = array<i64: 32, 128>}, {transform_indices = @transform_2, window_bounds = array<i64: 1, 128>}, {transform_indices = @transform_3, window_bounds = array<i64: 32, 128>}]} {
    %c0 = arith.constant 0 : index
    %c0_0 = arith.constant 0 : index
    %0 = vector.load %arg2[%c0, %c0_0] : memref<32x32xf32, #tpu.memory_space<vmem>>, vector<32x32xf32>
    %1 = arith.truncf %0 : vector<32x32xf32> to vector<32x32xbf16>
    %c0_1 = arith.constant 0 : index
    %c0_2 = arith.constant 0 : index
    %2 = vector.load %arg3[%c0_1, %c0_2] : memref<32x128xbf16, #tpu.memory_space<vmem>>, vector<32x128xbf16>
    %cst = arith.constant dense<0.000000e+00> : vector<32x128xf32>
    %3 = tpu.matmul %1, %2, %cst {dimension_numbers = #tpu.dot_dimension_numbers<[1], [0], [0], [1], [0, 0, 1, 1], [], []>} : vector<32x32xbf16>, vector<32x128xbf16>, vector<32x128xf32> -> vector<32x128xf32>
    %c0_3 = arith.constant 0 : index
    %c0_4 = arith.constant 0 : index
    %4 = vector.load %arg4[%c0_3, %c0_4] : memref<1x128xf32, #tpu.memory_space<vmem>>, vector<1x128xf32>
    %5 = vector.broadcast %4 : vector<1x128xf32> to vector<32x128xf32>
    %6 = arith.addf %3, %5 : vector<32x128xf32>
    %7 = arith.negf %6 : vector<32x128xf32>
    %8 = math.exp %7 : vector<32x128xf32>
    %cst_5 = arith.constant 1.000000e+00 : f32
    %9 = vector.broadcast %cst_5 : f32 to vector<32x128xf32>
    %10 = arith.addf %9, %8 : vector<32x128xf32>
    %11 = arith.divf %9, %10 : vector<32x128xf32>
    %c0_6 = arith.constant 0 : index
    %c0_7 = arith.constant 0 : index
    %12 = vector.load %arg5[%c0_6, %c0_7] : memref<32x128xf32, #tpu.memory_space<vmem>>, vector<32x128xf32>
    tpu.vector_store %arg5[%c0_6, %c0_7], %11 {strides = array<i32>} : memref<32x128xf32, #tpu.memory_space<vmem>>, vector<32x128xf32>,
    return
  }
  func.func @transform_0(%arg0: i32, %arg1: i32) -> (i32, i32) {
    %c0_i32 = arith.constant 0 : i32
    %c0_i32_0 = arith.constant 0 : i32
    return %arg0, %c0_i32 : i32, i32
  }
  func.func @transform_1(%arg0: i32, %arg1: i32) -> (i32, i32) {
    %c0_i32 = arith.constant 0 : i32
    %c0_i32_0 = arith.constant 0 : i32
    return %c0_i32, %arg1 : i32, i32
  }
  func.func @transform_2(%arg0: i32, %arg1: i32) -> (i32, i32) {
    %c0_i32 = arith.constant 0 : i32
    %c0_i32_0 = arith.constant 0 : i32
    return %c0_i32, %arg1 : i32, i32
  }
  func.func @transform_3(%arg0: i32, %arg1: i32) -> (i32, i32) {
    %c0_i32 = arith.constant 0 : i32
    return %arg0, %arg1 : i32, i32
  }
}

</mosaic_0001>

<bundles_post_ra>
// kernel: lr_forward.1
= control target key start
LH: loop header
LB: loop body
LE: loop exit
PB: predicated region body
PF: predicated region fallthrough
CT: control target
= control target key end

     0   :  { %s561_s12 = smov 0   ;;  %s563_s13 = smov 0   ;;  %s610_s0 = inlined_call_operand.vmem [shape: f32[64,32], index: 0, kind: input, shape index: {}]   ;;  %s611_s1 = inlined_call_operand.vmem [shape: bf16[32,128], index: 1, kind: input, shape index: {}]   ;;  %s612_s2 = inlined_call_operand.vmem [shape: f32[1,128], index: 2, kind: input, shape index: {}]   ;;  %s613_s3 = inlined_call_operand.vmem [shape: f32[64,128], index: 3, kind: output, shape index: {}]  }
   0x1   :  { %s565_s14 = smov 0  }
   0x2 LB: > { %s25_s15 = sadd.s32 1, %s535_s13  ;;  %p447_p0 = scmp.ge.s32.totalorder %s539_s14, 1  ;;  %s539_s14 = sphi %s565_s14, %s13_s14   ;;  %s535_s13 = sphi %s563_s13, %s615_s13   ;;  %s531_s12 = sphi %s561_s12, %s614_s12  }
   0x3   : > { %p27_p1 = scmp.ge.s32.totalorder %s25_s15, 2  ;;  %p169_p2 = scmp.lt.s32.totalorder %s539_s14, 3 }
   0x5   : > { %s617_s15 = smov (%p27_p1, %s25_s15), 0  ;;  %p170_p3 = pnand %p447_p0, %p169_p2 }
   0x6   : > { %s448_s18 = sshll.u32 (!%p170_p3), %s531_s12, 2 }
   0x7   : > { %173 = sbr.rel (%p170_p3) target bundleno = 257 (0x101), region = 32  ;;  %p204_p4 = scmp.lt.s32.totalorder (!%p170_p3), %s448_s18, 7 }
   0xc   : > { %v499_v0 = vld [vmem:[%s611_s1 + $0x8] sm:$0xff]   ;;  %v500_v1 = vld [vmem:[%s611_s1] sm:$0xff]   ;;  %s619_s18 = smov (!%p204_p4, %s448_s18), 7  ;;  %vm255_vm0 = vcmask 261120  }
   0xd   : > { %467 = vmatprep.subr.bf16.mxu0 %v499_v0  ;;  %s449_s21 = sshll.u32 %s619_s18, 3  ;;  %v452_v8 = vld [vmem:[%s612_s2] ss:$0 sm:$0xff] }
   0xe   : > { %468 = vmatpush3.bf16.msra.mxu0 %v499_v0  ;;  %s207_s24 = scalar_lea.vmem %s610_s0, %s449_s21  ;;  %s223_s29 = scalar_lea.vmem %s613_s3, %s449_s21 }
   0xf   : > { %469 = vmatprep.subr.bf16.mxu0 %v500_v1  ;;  %v226_v2 = vld [vmem:[%s207_s24] sm:$0xff]  ;;  %v227_v3 = vld [vmem:[%s207_s24 + $0x8] sm:$0xff]  ;;  %v228_v4 = vld [vmem:[%s207_s24 + $0x10] sm:$0xff] }
  0x10   : > { %v230_v5 = vpack.c.bf16 %v227_v3, %v226_v2  ;;  %v229_v6 = vld [vmem:[%s207_s24 + $0x18] sm:$0xff] }
  0x11   : > { %v231_v7 = vpack.c.bf16 %v229_v6, %v228_v4 }
  0x12   : > { %470 = vmatpush3.bf16.msra.mxu0 %v500_v1  ;;  %471 = vmatprep.mubr.msk.bf16.mxu0 %vm255_vm0, %v230_v5 }
  0x15   : > { %472 = vmatmul.mubr.msk.bf16.vlgmr.msra.gmra.mxu0 %vm255_vm0, %v231_v7 }
  0xd5   : > { %v473_v9 = vpop.f32.mrf.mxu0 }
  0xd6   : > { %v305_v10 = vadd.f32 %v473_v9, %v452_v8 }
  0xd7   : > { %v296_v11 = vpop.f32.mrf.mxu0 }
  0xd8   : > { %v297_v12 = vadd.f32 %v452_v8, %v296_v11  ;;  %v459_v13 = vmul.f32 -1.442695, %v305_v10 }
  0xd9   : > { %v474_v14 = vpop.f32.mrf.mxu0 }
  0xda   : > { %v457_v15 = vmul.f32 -1.442695, %v297_v12  ;;  %v308_v16 = vadd.f32 %v474_v14, %v452_v8 }
  0xdb   : > { %v299_v17 = vpop.f32.mrf.mxu0 }
  0xdc   : > { %501 = vpow2.f32 %v457_v15  ;;  %v460_v18 = vmul.f32 -1.442695, %v308_v16  ;;  %v300_v19 = vadd.f32 %v452_v8, %v299_v17 }
  0xdd   : > { %503 = vpow2.f32 %v459_v13 }
  0xde   : > { %505 = vpow2.f32 %v460_v18  ;;  %v458_v20 = vmul.f32 -1.442695, %v300_v19 }
  0xe0   : > { %507 = vpow2.f32 %v458_v20 }
  0xe9   : > { %v502_v21 = vpop.eup %501 }
  0xea   : > { %v504_v22 = vpop.eup %503  ;;  %v323_v23 = vadd.f32 1.0, %v502_v21 }
  0xeb   : > { %v506_v24 = vpop.eup %505  ;;  %v325_v26 = vadd.f32 1.0, %v504_v22 }
  0xec   : > { %509 = vrcp.f32 %v323_v23  ;;  %v326_v27 = vadd.f32 1.0, %v506_v24 }
  0xed   : > { %v508_v25 = vpop.eup %507 }
  0xee   : > { %v324_v28 = vadd.f32 1.0, %v508_v25 }
  0xf0   : > { %511 = vrcp.f32 %v324_v28 }
  0xf1   : > { %513 = vrcp.f32 %v325_v26 }
  0xf2   : > { %515 = vrcp.f32 %v326_v27 }
  0xf9   : > { %v510_v29 = vpop.eup %509 }
  0xfa   : > { %335 = vst [vmem:[%s223_s29] sm:$0xff] %v510_v29 }
  0xfd   : > { %v512_v30 = vpop.eup %511 }
  0xfe   : > { %v514_v31 = vpop.eup %513  ;;  %336 = vst [vmem:[%s223_s29 + $0x8] sm:$0xff] %v512_v30 }
  0xff   : > { %v516_v32 = vpop.eup %515  ;;  %337 = vst [vmem:[%s223_s29 + $0x10] sm:$0xff] %v514_v31 }
 0x100   : > { %338 = vst [vmem:[%s223_s29 + $0x18] sm:$0xff] %v516_v32 }
 0x101 PF: > { %s13_s14 = sadd.s32 1, %s539_s14   ;;  %s614_s12 = smov %s535_s13 }
 0x102   : > { %p10_p5 = scmp.ge.s32.totalorder %s13_s14, 4   ;;  %s615_s13 = smov %s617_s15 }
 0x104   :  { %12 = sbr.rel (!%p10_p5) target bundleno = 2 (0x2), region = 68 }

</bundles_post_ra>
